<compile_context>
chip_gen: v6e
topology: v6e:2x2x1
jax: 0.10.0
libtpu: 0.0.40
codegen_flags: <defaults>
</compile_context>

<pallas_src>
import jax
import jax.numpy as jnp
import numpy as np
from jax.experimental import pallas as pl
from jax.experimental.pallas import tpu as pltpu


BP = 8   # padded batch rows (full sublane occupancy)
FP = 8   # padded input-feature rows (8-aligned wih slab in the packed buffer)


def actor_kernel(xflat_ref,   # (T*BP, FP)      time-major, batch+feature padded
                 gpack_ref,   # (FP+H+8, 4H)    [wih pad | whh | bias row | 0s]
                 ppack_ref,   # (2H+16, H)      [w1 | b1 row | w2 pad | b2 row]
                 out_ref):    # (BP, 3)         softmax probabilities
    G = gpack_ref.shape[1]                     # 4H
    H = G // 4
    Bp = out_ref.shape[0]
    T = xflat_ref.shape[0] // Bp

    # ---- unpack parameters (static, 8-row-aligned ref slices) ---------------
    wih = gpack_ref[0:FP, :]                   # (FP, 4H), rows F..FP-1 zero
    whh = gpack_ref[FP:FP + H, :]              # (H, 4H)
    b = gpack_ref[FP + H:FP + H + 1, :]        # (1, 4H) = b_ih + b_hh

    w1 = ppack_ref[0:H, :]                     # (H, H)
    b1 = ppack_ref[H:H + 1, :]                 # (1, H)
    w2 = ppack_ref[H + 8:H + 8 + H, :]         # (H, H), lanes 3..H-1 zero
    b2 = ppack_ref[2 * H + 8:2 * H + 9, :]     # (1, H), lanes 3..H-1 zero

    # ---- hoisted input projection: one fused MXU dot for all T steps --------
    gates_all = jnp.dot(xflat_ref[...], wih,
                        preferred_element_type=jnp.float32) + b   # (T*BP, 4H)

    # ---- serial LSTM recurrence, fully unrolled (PyTorch gate order i,f,g,o)
    h = jnp.zeros((Bp, H), jnp.float32)
    c = jnp.zeros((Bp, H), jnp.float32)
    for t in range(T):
        gates = gates_all[t * Bp:(t + 1) * Bp, :] + jnp.dot(
            h, whh, preferred_element_type=jnp.float32)
        sig = jax.nn.sigmoid(gates)            # one EUP pass on full 128 lanes
        th = jnp.tanh(gates)                   # one EUP pass on full 128 lanes
        i_g = sig[:, 0 * H:1 * H]
        f_g = sig[:, 1 * H:2 * H]
        g_g = th[:, 2 * H:3 * H]
        o_g = sig[:, 3 * H:4 * H]
        c = f_g * c + i_g * g_g
        h = o_g * jnp.tanh(c)

    # ---- projection head: Linear(H,H) -> ReLU -> Linear(H,3) -> softmax -----
    z = jnp.maximum(jnp.dot(h, w1, preferred_element_type=jnp.float32) + b1, 0.0)
    logits = (jnp.dot(z, w2, preferred_element_type=jnp.float32) + b2)[:, 0:3]
    m = jnp.max(logits, axis=-1, keepdims=True)
    e = jnp.exp(logits - m)
    out_ref[...] = e / jnp.sum(e, axis=-1, keepdims=True)


def actor_forward(x, gpack, ppack):
    """x: (B, T, 6) batch-first sequence -> (B, 3) softmax probs."""
    x = x.astype(jnp.float32)
    B, T, F = x.shape

    # Pad batch->BP, features->FP, flatten time-major. Lives inside the same
    # jit as the pallas_call, so it is not a separate dispatch.
    xt = jnp.transpose(x, (1, 0, 2))                        # (T, B, F)
    xt = jnp.pad(xt, ((0, 0), (0, BP - B), (0, FP - F)))    # (T, BP, FP)
    xflat = xt.reshape(T * BP, FP)

    vmem = pl.BlockSpec(memory_space=pltpu.MemorySpace.VMEM)
    out = pl.pallas_call(
        actor_kernel,
        out_shape=jax.ShapeDtypeStruct((BP, 3), jnp.float32),
        in_specs=[vmem, vmem, vmem],
        out_specs=vmem,
    )(xflat, gpack, ppack)
    return out[:B]                                          # drop pad rows


actor_forward_jit = jax.jit(actor_forward)


def init_params(key, hidden):
    """Deterministic synthetic init mirroring the module's shapes.
    Weights: xavier-uniform (as in Actor.initialize); biases: small uniform.
    Returns packed kernel operands plus the raw layout for the reference."""
    H, F = hidden, 6
    ks = jax.random.split(key, 8)

    def xavier(k, shape):  # shape = (fan_out, fan_in) PyTorch layout
        bound = float(np.sqrt(6.0 / (shape[0] + shape[1])))
        return jax.random.uniform(k, shape, jnp.float32, -bound, bound)

    inv = 1.0 / float(np.sqrt(H))
    w_ih = xavier(ks[0], (4 * H, F))                  # PyTorch (4H, in)
    w_hh = xavier(ks[1], (4 * H, H))
    b_ih = jax.random.uniform(ks[2], (4 * H,), jnp.float32, -inv, inv)
    b_hh = jax.random.uniform(ks[3], (4 * H,), jnp.float32, -inv, inv)
    w1 = xavier(ks[4], (H, H))
    b1 = jax.random.uniform(ks[5], (H,), jnp.float32, -inv, inv)
    w2 = xavier(ks[6], (3, H))
    b2 = jax.random.uniform(ks[7], (3,), jnp.float32, -inv, inv)

    raw = {
        "wih": w_ih.T,                                # (F, 4H)
        "whh": w_hh.T,                                # (H, 4H)
        "b": (b_ih + b_hh).reshape(1, 4 * H),
        "w1": w1.T,                                   # (H, H)
        "b1": b1.reshape(1, H),
        "w2": w2.T,                                   # (H, 3)
        "b2": b2.reshape(1, 3),
    }

    # gpack: [wih padded to FP rows | whh (H rows) | bias row | zero rows]
    gpack = np.zeros((FP + H + 8, 4 * H), np.float32)
    gpack[0:F, :] = np.asarray(raw["wih"])
    gpack[FP:FP + H, :] = np.asarray(raw["whh"])
    gpack[FP + H, :] = np.asarray(raw["b"][0])

    # ppack: [w1 (H rows) | b1 row | pad | w2 lane-padded (H rows) | b2 row | pad]
    ppack = np.zeros((2 * H + 16, H), np.float32)
    ppack[0:H, :] = np.asarray(raw["w1"])
    ppack[H, :] = np.asarray(raw["b1"][0])
    ppack[H + 8:H + 8 + H, 0:3] = np.asarray(raw["w2"])
    ppack[2 * H + 8, 0:3] = np.asarray(raw["b2"][0])

    return {"gpack": jnp.asarray(gpack), "ppack": jnp.asarray(ppack), "raw": raw}


def actor_ref(x, p):
    """Pure-JAX reference of the same forward pass (dense-tensor branch)."""
    x = x.astype(jnp.float32)
    B, T, _ = x.shape
    H = p["whh"].shape[0]
    h = jnp.zeros((B, H), jnp.float32)
    c = jnp.zeros((B, H), jnp.float32)
    for t in range(T):
        gates = x[:, t, :] @ p["wih"] + h @ p["whh"] + p["b"]
        i = jax.nn.sigmoid(gates[:, :H])
        f = jax.nn.sigmoid(gates[:, H:2 * H])
        g = jnp.tanh(gates[:, 2 * H:3 * H])
        o = jax.nn.sigmoid(gates[:, 3 * H:])
        c = f * c + i * g
        h = o * jnp.tanh(c)
    z = jnp.maximum(h @ p["w1"] + p["b1"], 0.0)
    logits = z @ p["w2"] + p["b2"]
    return jax.nn.softmax(logits, axis=-1)


if __name__ == "__main__":
    B, T, F, H = 4, 8, 6, 32
    key = jax.random.PRNGKey(0)
    k_x, k_p = jax.random.split(key)
    x = jax.random.normal(k_x, (B, T, F), jnp.float32)
    params = init_params(k_p, H)

    probs = actor_forward_jit(x, params["gpack"], params["ppack"])
    probs = jax.block_until_ready(probs)

    ref = actor_ref(x, params["raw"])
    np.testing.assert_allclose(np.asarray(probs), np.asarray(ref),
                               rtol=1e-5, atol=1e-5)
    assert probs.shape == (B, 3)
    print("KERNEL_OK")
</pallas_src>

<mosaic_0001>
module attributes {stable_mosaic.version = 11 : i64} {
  func.func @actor_kernel(%arg0: memref<64x8xf32, #tpu.memory_space<vmem>>, %arg1: memref<48x128xf32, #tpu.memory_space<vmem>>, %arg2: memref<80x32xf32, #tpu.memory_space<vmem>>, %arg3: memref<8x3xf32, #tpu.memory_space<vmem>>) attributes {dimension_semantics = [], scalar_prefetch = 0 : i64, scratch_operands = 0 : i64, tpu.core_type = #tpu.core_type<tc>} {
    %c0 = arith.constant 0 : index
    %c0_0 = arith.constant 0 : index
    %0 = vector.load %arg1[%c0, %c0_0] : memref<48x128xf32, #tpu.memory_space<vmem>>, vector<8x128xf32>
    %c8 = arith.constant 8 : index
    %c0_1 = arith.constant 0 : index
    %1 = vector.load %arg1[%c8, %c0_1] : memref<48x128xf32, #tpu.memory_space<vmem>>, vector<32x128xf32>
    %c40 = arith.constant 40 : index
    %c0_2 = arith.constant 0 : index
    %2 = vector.load %arg1[%c40, %c0_2] : memref<48x128xf32, #tpu.memory_space<vmem>>, vector<1x128xf32>
    %c0_3 = arith.constant 0 : index
    %c0_4 = arith.constant 0 : index
    %3 = vector.load %arg2[%c0_3, %c0_4] : memref<80x32xf32, #tpu.memory_space<vmem>>, vector<32x32xf32>
    %c32 = arith.constant 32 : index
    %c0_5 = arith.constant 0 : index
    %4 = vector.load %arg2[%c32, %c0_5] : memref<80x32xf32, #tpu.memory_space<vmem>>, vector<1x32xf32>
    %c40_6 = arith.constant 40 : index
    %c0_7 = arith.constant 0 : index
    %5 = vector.load %arg2[%c40_6, %c0_7] : memref<80x32xf32, #tpu.memory_space<vmem>>, vector<32x32xf32>
    %c72 = arith.constant 72 : index
    %c0_8 = arith.constant 0 : index
    %6 = vector.load %arg2[%c72, %c0_8] : memref<80x32xf32, #tpu.memory_space<vmem>>, vector<1x32xf32>
    %c0_9 = arith.constant 0 : index
    %c0_10 = arith.constant 0 : index
    %7 = vector.load %arg0[%c0_9, %c0_10] : memref<64x8xf32, #tpu.memory_space<vmem>>, vector<64x8xf32>
    %cst = arith.constant dense<0.000000e+00> : vector<64x128xf32>
    %8 = tpu.matmul %7, %0, %cst {dimension_numbers = #tpu.dot_dimension_numbers<[1], [0], [0], [1], [0, 0, 1, 1], [], []>} : vector<64x8xf32>, vector<8x128xf32>, vector<64x128xf32> -> vector<64x128xf32>
    %9 = vector.broadcast %2 : vector<1x128xf32> to vector<64x128xf32>
    %10 = arith.addf %8, %9 : vector<64x128xf32>
    %cst_11 = arith.constant 0.000000e+00 : f32
    %11 = vector.broadcast %cst_11 : f32 to vector<8x32xf32>
    %cst_12 = arith.constant 0.000000e+00 : f32
    %12 = vector.broadcast %cst_12 : f32 to vector<8x32xf32>
    %13 = vector.extract_strided_slice %10 {offsets = [0, 0], sizes = [8, 128], strides = [1, 1]} : vector<64x128xf32> to vector<8x128xf32>
    %cst_13 = arith.constant dense<0.000000e+00> : vector<8x128xf32>
    %14 = tpu.matmul %11, %1, %cst_13 {dimension_numbers = #tpu.dot_dimension_numbers<[1], [0], [0], [1], [0, 0, 1, 1], [], []>} : vector<8x32xf32>, vector<32x128xf32>, vector<8x128xf32> -> vector<8x128xf32>
    %15 = arith.addf %13, %14 : vector<8x128xf32>
    %16 = arith.negf %15 : vector<8x128xf32>
    %17 = math.exp %16 : vector<8x128xf32>
    %cst_14 = arith.constant 1.000000e+00 : f32
    %18 = vector.broadcast %cst_14 : f32 to vector<8x128xf32>
    %19 = arith.addf %18, %17 : vector<8x128xf32>
    %20 = arith.divf %18, %19 : vector<8x128xf32>
    %21 = math.tanh %15 : vector<8x128xf32>
    %22 = vector.extract_strided_slice %20 {offsets = [0, 0], sizes = [8, 32], strides = [1, 1]} : vector<8x128xf32> to vector<8x32xf32>
    %23 = vector.extract_strided_slice %20 {offsets = [0, 32], sizes = [8, 32], strides = [1, 1]} : vector<8x128xf32> to vector<8x32xf32>
    %24 = vector.extract_strided_slice %21 {offsets = [0, 64], sizes = [8, 32], strides = [1, 1]} : vector<8x128xf32> to vector<8x32xf32>
    %25 = vector.extract_strided_slice %20 {offsets = [0, 96], sizes = [8, 32], strides = [1, 1]} : vector<8x128xf32> to vector<8x32xf32>
    %26 = arith.mulf %23, %12 : vector<8x32xf32>
    %27 = arith.mulf %22, %24 : vector<8x32xf32>
    %28 = arith.addf %26, %27 : vector<8x32xf32>
    %29 = math.tanh %28 : vector<8x32xf32>
    %30 = arith.mulf %25, %29 : vector<8x32xf32>
    %31 = vector.extract_strided_slice %10 {offsets = [8, 0], sizes = [8, 128], strides = [1, 1]} : vector<64x128xf32> to vector<8x128xf32>
    %cst_15 = arith.constant dense<0.000000e+00> : vector<8x128xf32>
    %32 = tpu.matmul %30, %1, %cst_15 {dimension_numbers = #tpu.dot_dimension_numbers<[1], [0], [0], [1], [0, 0, 1, 1], [], []>} : vector<8x32xf32>, vector<32x128xf32>, vector<8x128xf32> -> vector<8x128xf32>
    %33 = arith.addf %31, %32 : vector<8x128xf32>
    %34 = arith.negf %33 : vector<8x128xf32>
    %35 = math.exp %34 : vector<8x128xf32>
    %cst_16 = arith.constant 1.000000e+00 : f32
    %36 = vector.broadcast %cst_16 : f32 to vector<8x128xf32>
    %37 = arith.addf %36, %35 : vector<8x128xf32>
    %38 = arith.divf %36, %37 : vector<8x128xf32>
    %39 = math.tanh %33 : vector<8x128xf32>
    %40 = vector.extract_strided_slice %38 {offsets = [0, 0], sizes = [8, 32], strides = [1, 1]} : vector<8x128xf32> to vector<8x32xf32>
    %41 = vector.extract_strided_slice %38 {offsets = [0, 32], sizes = [8, 32], strides = [1, 1]} : vector<8x128xf32> to vector<8x32xf32>
    %42 = vector.extract_strided_slice %39 {offsets = [0, 64], sizes = [8, 32], strides = [1, 1]} : vector<8x128xf32> to vector<8x32xf32>
    %43 = vector.extract_strided_slice %38 {offsets = [0, 96], sizes = [8, 32], strides = [1, 1]} : vector<8x128xf32> to vector<8x32xf32>
    %44 = arith.mulf %41, %28 : vector<8x32xf32>
    %45 = arith.mulf %40, %42 : vector<8x32xf32>
    %46 = arith.addf %44, %45 : vector<8x32xf32>
    %47 = math.tanh %46 : vector<8x32xf32>
    %48 = arith.mulf %43, %47 : vector<8x32xf32>
    %49 = vector.extract_strided_slice %10 {offsets = [16, 0], sizes = [8, 128], strides = [1, 1]} : vector<64x128xf32> to vector<8x128xf32>
    %cst_17 = arith.constant dense<0.000000e+00> : vector<8x128xf32>
    %50 = tpu.matmul %48, %1, %cst_17 {dimension_numbers = #tpu.dot_dimension_numbers<[1], [0], [0], [1], [0, 0, 1, 1], [], []>} : vector<8x32xf32>, vector<32x128xf32>, vector<8x128xf32> -> vector<8x128xf32>
    %51 = arith.addf %49, %50 : vector<8x128xf32>
    %52 = arith.negf %51 : vector<8x128xf32>
    %53 = math.exp %52 : vector<8x128xf32>
    %cst_18 = arith.constant 1.000000e+00 : f32
    %54 = vector.broadcast %cst_18 : f32 to vector<8x128xf32>
    %55 = arith.addf %54, %53 : vector<8x128xf32>
    %56 = arith.divf %54, %55 : vector<8x128xf32>
    %57 = math.tanh %51 : vector<8x128xf32>
    %58 = vector.extract_strided_slice %56 {offsets = [0, 0], sizes = [8, 32], strides = [1, 1]} : vector<8x128xf32> to vector<8x32xf32>
    %59 = vector.extract_strided_slice %56 {offsets = [0, 32], sizes = [8, 32], strides = [1, 1]} : vector<8x128xf32> to vector<8x32xf32>
    %60 = vector.extract_strided_slice %57 {offsets = [0, 64], sizes = [8, 32], strides = [1, 1]} : vector<8x128xf32> to vector<8x32xf32>
    %61 = vector.extract_strided_slice %56 {offsets = [0, 96], sizes = [8, 32], strides = [1, 1]} : vector<8x128xf32> to vector<8x32xf32>
    %62 = arith.mulf %59, %46 : vector<8x32xf32>
    %63 = arith.mulf %58, %60 : vector<8x32xf32>
    %64 = arith.addf %62, %63 : vector<8x32xf32>
    %65 = math.tanh %64 : vector<8x32xf32>
    %66 = arith.mulf %61, %65 : vector<8x32xf32>
    %67 = vector.extract_strided_slice %10 {offsets = [24, 0], sizes = [8, 128], strides = [1, 1]} : vector<64x128xf32> to vector<8x128xf32>
    %cst_19 = arith.constant dense<0.000000e+00> : vector<8x128xf32>
    %68 = tpu.matmul %66, %1, %cst_19 {dimension_numbers = #tpu.dot_dimension_numbers<[1], [0], [0], [1], [0, 0, 1, 1], [], []>} : vector<8x32xf32>, vector<32x128xf32>, vector<8x128xf32> -> vector<8x128xf32>
    %69 = arith.addf %67, %68 : vector<8x128xf32>
    %70 = arith.negf %69 : vector<8x128xf32>
    %71 = math.exp %70 : vector<8x128xf32>
    %cst_20 = arith.constant 1.000000e+00 : f32
    %72 = vector.broadcast %cst_20 : f32 to vector<8x128xf32>
    %73 = arith.addf %72, %71 : vector<8x128xf32>
    %74 = arith.divf %72, %73 : vector<8x128xf32>
    %75 = math.tanh %69 : vector<8x128xf32>
    %76 = vector.extract_strided_slice %74 {offsets = [0, 0], sizes = [8, 32], strides = [1, 1]} : vector<8x128xf32> to vector<8x32xf32>
    %77 = vector.extract_strided_slice %74 {offsets = [0, 32], sizes = [8, 32], strides = [1, 1]} : vector<8x128xf32> to vector<8x32xf32>
    %78 = vector.extract_strided_slice %75 {offsets = [0, 64], sizes = [8, 32], strides = [1, 1]} : vector<8x128xf32> to vector<8x32xf32>
    %79 = vector.extract_strided_slice %74 {offsets = [0, 96], sizes = [8, 32], strides = [1, 1]} : vector<8x128xf32> to vector<8x32xf32>
    %80 = arith.mulf %77, %64 : vector<8x32xf32>
    %81 = arith.mulf %76, %78 : vector<8x32xf32>
    %82 = arith.addf %80, %81 : vector<8x32xf32>
    %83 = math.tanh %82 : vector<8x32xf32>
    %84 = arith.mulf %79, %83 : vector<8x32xf32>
    %85 = vector.extract_strided_slice %10 {offsets = [32, 0], sizes = [8, 128], strides = [1, 1]} : vector<64x128xf32> to vector<8x128xf32>
    %cst_21 = arith.constant dense<0.000000e+00> : vector<8x128xf32>
    %86 = tpu.matmul %84, %1, %cst_21 {dimension_numbers = #tpu.dot_dimension_numbers<[1], [0], [0], [1], [0, 0, 1, 1], [], []>} : vector<8x32xf32>, vector<32x128xf32>, vector<8x128xf32> -> vector<8x128xf32>
    %87 = arith.addf %85, %86 : vector<8x128xf32>
    %88 = arith.negf %87 : vector<8x128xf32>
    %89 = math.exp %88 : vector<8x128xf32>
    %cst_22 = arith.constant 1.000000e+00 : f32
    %90 = vector.broadcast %cst_22 : f32 to vector<8x128xf32>
    %91 = arith.addf %90, %89 : vector<8x128xf32>
    %92 = arith.divf %90, %91 : vector<8x128xf32>
    %93 = math.tanh %87 : vector<8x128xf32>
    %94 = vector.extract_strided_slice %92 {offsets = [0, 0], sizes = [8, 32], strides = [1, 1]} : vector<8x128xf32> to vector<8x32xf32>
    %95 = vector.extract_strided_slice %92 {offsets = [0, 32], sizes = [8, 32], strides = [1, 1]} : vector<8x128xf32> to vector<8x32xf32>
    %96 = vector.extract_strided_slice %93 {offsets = [0, 64], sizes = [8, 32], strides = [1, 1]} : vector<8x128xf32> to vector<8x32xf32>
    %97 = vector.extract_strided_slice %92 {offsets = [0, 96], sizes = [8, 32], strides = [1, 1]} : vector<8x128xf32> to vector<8x32xf32>
    %98 = arith.mulf %95, %82 : vector<8x32xf32>
    %99 = arith.mulf %94, %96 : vector<8x32xf32>
    %100 = arith.addf %98, %99 : vector<8x32xf32>
    %101 = math.tanh %100 : vector<8x32xf32>
    %102 = arith.mulf %97, %101 : vector<8x32xf32>
    %103 = vector.extract_strided_slice %10 {offsets = [40, 0], sizes = [8, 128], strides = [1, 1]} : vector<64x128xf32> to vector<8x128xf32>
    %cst_23 = arith.constant dense<0.000000e+00> : vector<8x128xf32>
    %104 = tpu.matmul %102, %1, %cst_23 {dimension_numbers = #tpu.dot_dimension_numbers<[1], [0], [0], [1], [0, 0, 1, 1], [], []>} : vector<8x32xf32>, vector<32x128xf32>, vector<8x128xf32> -> vector<8x128xf32>
    %105 = arith.addf %103, %104 : vector<8x128xf32>
    %106 = arith.negf %105 : vector<8x128xf32>
    %107 = math.exp %106 : vector<8x128xf32>
    %cst_24 = arith.constant 1.000000e+00 : f32
    %108 = vector.broadcast %cst_24 : f32 to vector<8x128xf32>
    %109 = arith.addf %108, %107 : vector<8x128xf32>
    %110 = arith.divf %108, %109 : vector<8x128xf32>
    %111 = math.tanh %105 : vector<8x128xf32>
    %112 = vector.extract_strided_slice %110 {offsets = [0, 0], sizes = [8, 32], strides = [1, 1]} : vector<8x128xf32> to vector<8x32xf32>
    %113 = vector.extract_strided_slice %110 {offsets = [0, 32], sizes = [8, 32], strides = [1, 1]} : vector<8x128xf32> to vector<8x32xf32>
    %114 = vector.extract_strided_slice %111 {offsets = [0, 64], sizes = [8, 32], strides = [1, 1]} : vector<8x128xf32> to vector<8x32xf32>
    %115 = vector.extract_strided_slice %110 {offsets = [0, 96], sizes = [8, 32], strides = [1, 1]} : vector<8x128xf32> to vector<8x32xf32>
    %116 = arith.mulf %113, %100 : vector<8x32xf32>
    %117 = arith.mulf %112, %114 : vector<8x32xf32>
    %118 = arith.addf %116, %117 : vector<8x32xf32>
    %119 = math.tanh %118 : vector<8x32xf32>
    %120 = arith.mulf %115, %119 : vector<8x32xf32>
    %121 = vector.extract_strided_slice %10 {offsets = [48, 0], sizes = [8, 128], strides = [1, 1]} : vector<64x128xf32> to vector<8x128xf32>
    %cst_25 = arith.constant dense<0.000000e+00> : vector<8x128xf32>
    %122 = tpu.matmul %120, %1, %cst_25 {dimension_numbers = #tpu.dot_dimension_numbers<[1], [0], [0], [1], [0, 0, 1, 1], [], []>} : vector<8x32xf32>, vector<32x128xf32>, vector<8x128xf32> -> vector<8x128xf32>
    %123 = arith.addf %121, %122 : vector<8x128xf32>
    %124 = arith.negf %123 : vector<8x128xf32>
    %125 = math.exp %124 : vector<8x128xf32>
    %cst_26 = arith.constant 1.000000e+00 : f32
    %126 = vector.broadcast %cst_26 : f32 to vector<8x128xf32>
    %127 = arith.addf %126, %125 : vector<8x128xf32>
    %128 = arith.divf %126, %127 : vector<8x128xf32>
    %129 = math.tanh %123 : vector<8x128xf32>
    %130 = vector.extract_strided_slice %128 {offsets = [0, 0], sizes = [8, 32], strides = [1, 1]} : vector<8x128xf32> to vector<8x32xf32>
    %131 = vector.extract_strided_slice %128 {offsets = [0, 32], sizes = [8, 32], strides = [1, 1]} : vector<8x128xf32> to vector<8x32xf32>
    %132 = vector.extract_strided_slice %129 {offsets = [0, 64], sizes = [8, 32], strides = [1, 1]} : vector<8x128xf32> to vector<8x32xf32>
    %133 = vector.extract_strided_slice %128 {offsets = [0, 96], sizes = [8, 32], strides = [1, 1]} : vector<8x128xf32> to vector<8x32xf32>
    %134 = arith.mulf %131, %118 : vector<8x32xf32>
    %135 = arith.mulf %130, %132 : vector<8x32xf32>
    %136 = arith.addf %134, %135 : vector<8x32xf32>
    %137 = math.tanh %136 : vector<8x32xf32>
    %138 = arith.mulf %133, %137 : vector<8x32xf32>
    %139 = vector.extract_strided_slice %10 {offsets = [56, 0], sizes = [8, 128], strides = [1, 1]} : vector<64x128xf32> to vector<8x128xf32>
    %cst_27 = arith.constant dense<0.000000e+00> : vector<8x128xf32>
    %140 = tpu.matmul %138, %1, %cst_27 {dimension_numbers = #tpu.dot_dimension_numbers<[1], [0], [0], [1], [0, 0, 1, 1], [], []>} : vector<8x32xf32>, vector<32x128xf32>, vector<8x128xf32> -> vector<8x128xf32>
    %141 = arith.addf %139, %140 : vector<8x128xf32>
    %142 = arith.negf %141 : vector<8x128xf32>
    %143 = math.exp %142 : vector<8x128xf32>
    %cst_28 = arith.constant 1.000000e+00 : f32
    %144 = vector.broadcast %cst_28 : f32 to vector<8x128xf32>
    %145 = arith.addf %144, %143 : vector<8x128xf32>
    %146 = arith.divf %144, %145 : vector<8x128xf32>
    %147 = math.tanh %141 : vector<8x128xf32>
    %148 = vector.extract_strided_slice %146 {offsets = [0, 0], sizes = [8, 32], strides = [1, 1]} : vector<8x128xf32> to vector<8x32xf32>
    %149 = vector.extract_strided_slice %146 {offsets = [0, 32], sizes = [8, 32], strides = [1, 1]} : vector<8x128xf32> to vector<8x32xf32>
    %150 = vector.extract_strided_slice %147 {offsets = [0, 64], sizes = [8, 32], strides = [1, 1]} : vector<8x128xf32> to vector<8x32xf32>
    %151 = vector.extract_strided_slice %146 {offsets = [0, 96], sizes = [8, 32], strides = [1, 1]} : vector<8x128xf32> to vector<8x32xf32>
    %152 = arith.mulf %149, %136 : vector<8x32xf32>
    %153 = arith.mulf %148, %150 : vector<8x32xf32>
    %154 = arith.addf %152, %153 : vector<8x32xf32>
    %155 = math.tanh %154 : vector<8x32xf32>
    %156 = arith.mulf %151, %155 : vector<8x32xf32>
    %cst_29 = arith.constant dense<0.000000e+00> : vector<8x32xf32>
    %157 = tpu.matmul %156, %3, %cst_29 {dimension_numbers = #tpu.dot_dimension_numbers<[1], [0], [0], [1], [0, 0, 1, 1], [], []>} : vector<8x32xf32>, vector<32x32xf32>, vector<8x32xf32> -> vector<8x32xf32>
    %158 = vector.broadcast %4 : vector<1x32xf32> to vector<8x32xf32>
    %159 = arith.addf %157, %158 : vector<8x32xf32>
    %cst_30 = arith.constant 0.000000e+00 : f32
    %160 = vector.broadcast %cst_30 : f32 to vector<8x32xf32>
    %161 = arith.maximumf %159, %160 : vector<8x32xf32>
    %cst_31 = arith.constant dense<0.000000e+00> : vector<8x32xf32>
    %162 = tpu.matmul %161, %5, %cst_31 {dimension_numbers = #tpu.dot_dimension_numbers<[1], [0], [0], [1], [0, 0, 1, 1], [], []>} : vector<8x32xf32>, vector<32x32xf32>, vector<8x32xf32> -> vector<8x32xf32>
    %163 = vector.broadcast %6 : vector<1x32xf32> to vector<8x32xf32>
    %164 = arith.addf %162, %163 : vector<8x32xf32>
    %165 = vector.extract_strided_slice %164 {offsets = [0, 0], sizes = [8, 3], strides = [1, 1]} : vector<8x32xf32> to vector<8x3xf32>
    %cst_32 = arith.constant dense<0xFF800000> : vector<8xf32>
    %166 = vector.multi_reduction <maximumf>, %165, %cst_32 [1] : vector<8x3xf32> to vector<8xf32>
    %167 = vector.shape_cast %166 : vector<8xf32> to vector<8x1xf32>
    %168 = vector.broadcast %167 : vector<8x1xf32> to vector<8x3xf32>
    %169 = arith.subf %165, %168 : vector<8x3xf32>
    %170 = math.exp %169 : vector<8x3xf32>
    %cst_33 = arith.constant dense<0.000000e+00> : vector<8xf32>
    %171 = vector.multi_reduction <add>, %170, %cst_33 [1] : vector<8x3xf32> to vector<8xf32>
    %172 = vector.shape_cast %171 : vector<8xf32> to vector<8x1xf32>
    %173 = vector.broadcast %172 : vector<8x1xf32> to vector<8x3xf32>
    %174 = arith.divf %170, %173 : vector<8x3xf32>
    %c0_34 = arith.constant 0 : index
    %c0_35 = arith.constant 0 : index
    %175 = vector.load %arg3[%c0_34, %c0_35] : memref<8x3xf32, #tpu.memory_space<vmem>>, vector<8x3xf32>
    tpu.vector_store %arg3[%c0_34, %c0_35], %174 {strides = array<i32>} : memref<8x3xf32, #tpu.memory_space<vmem>>, vector<8x3xf32>,
    return
  }
}

</mosaic_0001>

<bundles_post_ra>
// kernel: actor_forward.1
= control target key start
LH: loop header
LB: loop body
LE: loop exit
PB: predicated region body
PF: predicated region fallthrough
CT: control target
= control target key end

     0   :  { %vm42_vm0 = vcmask 64512   ;;  %v1428_v0 = vmov 0.0   ;;  %vm1429_vm1 = vmmov 0   ;;  %s1430_s28 = smov 64   ;;  %vm172_vm2 = vcmask 261120   ;;  %s1702_s1 = inlined_call_operand.vmem [shape: f32[48,128], index: 1, kind: input, shape index: {}]   ;;  %s1703_s0 = inlined_call_operand.vmem [shape: f32[64,8], index: 0, kind: input, shape index: {}]   ;;  %s1704_s2 = inlined_call_operand.vmem [shape: f32[80,32], index: 2, kind: input, shape index: {}]   ;;  %s1705_s3 = inlined_call_operand.vmem [shape: f32[8,3], index: 3, kind: output, shape index: {}]  }
   0x1   :  { %1246 = vmatprep.subr.mxu1 %v1428_v0  ;;  %v14_v1 = vld [vmem:[%s1702_s1] sm:$0xff]  ;;  %1254 = vmatprep.mubr.msk.f32.mxu1 %vm1429_vm1, %v1428_v0  ;;  %v31_v4 = vld [vmem:[%s1703_s0 + $0x8] sm:$0xff]  ;;  %v1473_v5 = vld [vmem:[%s1702_s1 + $0x18] sm:$0xff]  ;;  %vm1128_vm3 = vcmask 23552  }
   0x2   :  { %v1459_v2 = vld [vmem:[%s1702_s1 + $0x20] sm:$0xff]  ;;  %1232 = vmatprep.subr.mxu0 %v14_v1  ;;  %v1481_v6 = vld [vmem:[%s1702_s1 + $0x10] sm:$0xff]  ;;  %v1489_v7 = vld [vmem:[%s1702_s1 + $0x8] sm:$0xff] }
   0x3   :  { %v30_v3 = vld [vmem:[%s1703_s0] sm:$0xff]  ;;  %1247 = vmatpush3.msra.mxu1 %v1459_v2  ;;  %1233 = vmatpush3.msra.mxu0 %v14_v1  ;;  %v1517_v9 = vld [vmem:[%s1702_s1 + $0x28] ss:$0 sm:$0xff]  ;;  %s1431_s1 = smov 32   ;;  %v32_v43 = vld [vmem:[%s1703_s0 + $0x10] sm:$0xff] }
   0x4   :  { %1234 = vmatprep.mubr.msk.f32.mxu0 %vm42_vm0, %v30_v3  ;;  %1248 = vmatprep.subr.mxu1 %v1428_v0  ;;  %v33_v44 = vld [vmem:[%s1703_s0 + $0x18] sm:$0xff]  ;;  %v34_v45 = vld [vmem:[%s1703_s0 + $0x20] sm:$0xff]  ;;  %v35_v46 = vld [vmem:[%s1703_s0 + $0x28] sm:$0xff] }
   0x5   :  { %1235 = vmatmul.mubr.msk.f32.vlgmr.msra.gmra.mxu0 %vm42_vm0, %v31_v4  ;;  %1249 = vmatpush3.msra.mxu1 %v1473_v5  ;;  %v36_v47 = vld [vmem:[%s1703_s0 + $0x30] sm:$0xff]  ;;  %v37_v48 = vld [vmem:[%s1703_s0 + $0x38] sm:$0xff] }
   0x6   :  { %1268 = vmatprep.subr.mxu0 %v1428_v0  ;;  %1250 = vmatprep.subr.mxu1 %v1428_v0 }
   0x7   :  { %1269 = vmatpush3.msra.mxu0 %v1459_v2  ;;  %1251 = vmatpush3.msra.mxu1 %v1481_v6 }
   0x8   :  { %1270 = vmatprep.subr.mxu0 %v1428_v0  ;;  %1252 = vmatprep.subr.mxu1 %v1428_v0 }
   0x9   :  { %1271 = vmatpush3.msra.mxu0 %v1473_v5  ;;  %1253 = vmatpush3.msra.mxu1 %v1489_v7 }
   0xa   :  { %1272 = vmatprep.subr.mxu0 %v1428_v0  ;;  %1255 = vmatmul.mubr.f32.vlgmr.msra.gmra.mxu1 %v1428_v0 }
   0xb   :  { %1257 = vmatprep.subr.mxu1 %v1428_v0  ;;  %1265 = vmatprep.mubr.msk.f32.mxu1 %vm1429_vm1, %v1428_v0 }
   0xc   :  { %1258 = vmatpush3.msra.mxu1 %v1459_v2  ;;  %1273 = vmatpush3.msra.mxu0 %v1481_v6 }
   0xd   :  { %1259 = vmatprep.subr.mxu1 %v1428_v0  ;;  %1274 = vmatprep.subr.mxu0 %v1428_v0 }
   0xe   :  { %1260 = vmatpush3.msra.mxu1 %v1473_v5  ;;  %1275 = vmatpush3.msra.mxu0 %v1489_v7 }
   0xf   :  { %1261 = vmatprep.subr.mxu1 %v1428_v0  ;;  %1290 = vmatprep.subr.mxu0 %v1428_v0 }
  0x10   :  { %1262 = vmatpush3.msra.mxu1 %v1481_v6  ;;  %1237 = vmatprep.mubr.msk.f32.mxu0 %vm42_vm0, %v32_v43 }
  0x11   :  { %1263 = vmatprep.subr.mxu1 %v1428_v0  ;;  %1238 = vmatmul.mubr.msk.f32.gmra.mxu0 %vm42_vm0, %v33_v44 }
  0x12   :  { %1264 = vmatpush3.msra.mxu1 %v1489_v7  ;;  %1240 = vmatprep.mubr.msk.f32.mxu0 %vm42_vm0, %v34_v45 }
  0x13   :  { %1279 = vmatprep.subr.mxu1 %v1428_v0 }
  0x15   :  { %1241 = vmatmul.mubr.msk.f32.gmra.mxu0 %vm42_vm0, %v35_v46 }
  0x16   :  { %1243 = vmatprep.mubr.msk.f32.mxu0 %vm42_vm0, %v36_v47 }
  0x19   :  { %1244 = vmatmul.mubr.msk.f32.gmra.mxu0 %vm42_vm0, %v37_v48 }
  0x1a   :  { %1276 = vmatprep.mubr.msk.f32.mxu0 %vm1429_vm1, %v1428_v0 }
  0xc5   :  { %v1236_v8 = vpop.f32.mrf.mxu0 }
  0xc6   :  { %v139_v29 = vadd.f32 %v1236_v8, %v1517_v9 }
  0xc7   :  { %v133_v10 = vpop.f32.mrf.mxu0 }
  0xc8   :  { %v134_v11 = vadd.f32 %v1517_v9, %v133_v10 }
  0xca   :  { %v242_v12 = vpop.f32.mrf.mxu1 }
  0xcb   :  { %v246_v13 = vadd.f32 %v242_v12, %v134_v11 }
  0xcc   :  { %v1256_v14 = vpop.f32.mrf.mxu1 }
  0xcd   :  { %1360 = vtanh.f32 %v246_v13  ;;  %v1154_v16 = vmul.f32 -1.442695, %v246_v13 }
  0xcf   :  { %1362 = vpow2.f32 %v1154_v16 }
  0xd1   :  { %v1239_v53 = vpop.f32.mrf.mxu0 }
  0xd3   :  { %v143_v54 = vpop.f32.mrf.mxu0 }
  0xd4   :  { %v144_v59 = vadd.f32 %v1517_v9, %v143_v54 }
  0xd5   :  { %v1577_v55 = vpop.f32.mrf.mxu0 }
  0xd7   :  { %v1579_v56 = vpop.f32.mrf.mxu0 }
  0xd9   :  { %v1581_v57 = vpop.f32.mrf.mxu0 }
  0xda   :  { %v1361_v15 = vpop.eup %1360 }
  0xdb   :  { %256 = vrot.lane.b32.xlu0 %v1361_v15, %s1430_s28  ;;  %v1583_v58 = vpop.f32.mrf.mxu0 }
  0xdc   :  { %v1363_v17 = vpop.eup %1362 }
  0xdd   :  { %v250_v18 = vadd.f32 1.0, %v1363_v17 }
  0xdf   :  { %1364 = vrcp.f32 %v250_v18 }
  0xec   :  { %v1365_v19 = vpop.eup %1364 }
  0xed   :  { %v254_v22 = vmul.f32 0.0, %v1365_v19 }
 0x14d   :  { %v257_v20 = vpop.permute.xlu0 %256 }
 0x14e   :  { %v259_v21 = vmul.f32 %v1365_v19, %v257_v20 }
 0x150   :  { %261 = vrot.lane.b32.xlu0 %v259_v21, %s1431_s1 }
 0x1c2   :  { %v262_v23 = vpop.permute.xlu0 %261 }
 0x1c3   :  { %v264_v24 = vadd.f32 %v262_v23, %v254_v22 }
 0x1c5   :  { %1366 = vtanh.f32 %v264_v24 }
 0x1d2   :  { %v1367_v25 = vpop.eup %1366 }
 0x1d3   :  { %267 = vrot.lane.b32.xlu1 %v1367_v25, %s1430_s28 }
 0x245   :  { %v268_v26 = vpop.permute.xlu1 %267 }
 0x246   :  { %v270_v27 = vmul.f32 %v1365_v19, %v268_v26  ;;  %v149_v19 = vadd.f32 %v1239_v53, %v1517_v9 }
 0x248   :  { %272 = vrot.lane.b32.xlu1 %v270_v27, %s1431_s1 }
 0x2ba   :  { %v273_v28 = vpop.permute.xlu1 %272 }
 0x2bb   :  { %1266 = vmatmul.mubr.msk.f32.vlgmr.msra.gmra.mxu1 %vm172_vm2, %v273_v28 }
 0x2bc   :  { %1280 = vmatpush3.msra.mxu1 %v1459_v2  ;;  %1287 = vmatprep.mubr.msk.f32.mxu1 %vm1429_vm1, %v1428_v0 }
 0x2bd   :  { %1281 = vmatprep.subr.mxu1 %v1428_v0 }
 0x2be   :  { %1282 = vmatpush3.msra.mxu1 %v1473_v5 }
 0x2bf   :  { %1283 = vmatprep.subr.mxu1 %v1428_v0 }
 0x2c0   :  { %1284 = vmatpush3.msra.mxu1 %v1481_v6 }
 0x2c1   :  { %1285 = vmatprep.subr.mxu1 %v1428_v0 }
 0x2c2   :  { %1286 = vmatpush3.msra.mxu1 %v1489_v7 }
 0x2c3   :  { %1301 = vmatprep.subr.mxu1 %v1428_v0 }
 0x37b   :  { %v342_v30 = vpop.f32.mrf.mxu1 }
 0x37c   :  { %v346_v31 = vadd.f32 %v342_v30, %v139_v29 }
 0x37d   :  { %v1267_v32 = vpop.f32.mrf.mxu1 }
 0x37e   :  { %1368 = vtanh.f32 %v346_v31  ;;  %v1156_v34 = vmul.f32 -1.442695, %v346_v31 }
 0x380   :  { %1370 = vpow2.f32 %v1156_v34 }
 0x38b   :  { %v1369_v33 = vpop.eup %1368 }
 0x38c   :  { %356 = vrot.lane.b32.xlu0 %v1369_v33, %s1430_s28 }
 0x38d   :  { %v1371_v35 = vpop.eup %1370 }
 0x38e   :  { %v350_v36 = vadd.f32 1.0, %v1371_v35 }
 0x390   :  { %1372 = vrcp.f32 %v350_v36 }
 0x39d   :  { %v1373_v37 = vpop.eup %1372 }
 0x39e   :  { %v354_v40 = vmul.f32 %v1373_v37, %v264_v24 }
 0x3fe   :  { %v357_v38 = vpop.permute.xlu0 %356 }
 0x3ff   :  { %v359_v39 = vmul.f32 %v1373_v37, %v357_v38 }
 0x401   :  { %361 = vrot.lane.b32.xlu1 %v359_v39, %s1431_s1 }
 0x473   :  { %v362_v41 = vpop.permute.xlu1 %361 }
 0x474   :  { %v364_v42 = vadd.f32 %v362_v41, %v354_v40 }
 0x476   :  { %1374 = vtanh.f32 %v364_v42 }
 0x483   :  { %v1375_v49 = vpop.eup %1374 }
 0x484   :  { %367 = vrot.lane.b32.xlu0 %v1375_v49, %s1430_s28 }
 0x4f6   :  { %v368_v50 = vpop.permute.xlu0 %367 }
 0x4f7   :  { %v370_v51 = vmul.f32 %v1373_v37, %v368_v50  ;;  %v154_v37 = vadd.f32 %v1517_v9, %v1579_v56 }
 0x4f9   :  { %372 = vrot.lane.b32.xlu1 %v370_v51, %s1431_s1 }
 0x56b   :  { %v373_v52 = vpop.permute.xlu1 %372 }
 0x56c   :  { %1277 = vmatmul.mubr.msk.f32.vlgmr.msra.gmra.mxu0 %vm172_vm2, %v373_v52 }
 0x56d   :  { %1291 = vmatpush3.msra.mxu0 %v1459_v2  ;;  %1298 = vmatprep.mubr.msk.f32.mxu0 %vm1429_vm1, %v1428_v0 }
 0x56e   :  { %1292 = vmatprep.subr.mxu0 %v1428_v0 }
 0x56f   :  { %1293 = vmatpush3.msra.mxu0 %v1473_v5 }
 0x570   :  { %1294 = vmatprep.subr.mxu0 %v1428_v0 }
 0x571   :  { %1295 = vmatpush3.msra.mxu0 %v1481_v6 }
 0x572   :  { %1296 = vmatprep.subr.mxu0 %v1428_v0 }
 0x573   :  { %1297 = vmatpush3.msra.mxu0 %v1489_v7 }
 0x574   :  { %1312 = vmatprep.subr.mxu0 %v1428_v0 }
 0x62c   :  { %v442_v60 = vpop.f32.mrf.mxu0 }
 0x62d   :  { %v446_v61 = vadd.f32 %v442_v60, %v144_v59 }
 0x62e   :  { %v1278_v62 = vpop.f32.mrf.mxu0 }
 0x62f   :  { %1376 = vtanh.f32 %v446_v61  ;;  %v1158_v1 = vmul.f32 -1.442695, %v446_v61 }
 0x631   :  { %1378 = vpow2.f32 %v1158_v1 }
 0x63c   :  { %v1377_v63 = vpop.eup %1376 }
 0x63d   :  { %456 = vrot.lane.b32.xlu0 %v1377_v63, %s1430_s28 }
 0x63e   :  { %v1379_v3 = vpop.eup %1378 }
 0x63f   :  { %v450_v4 = vadd.f32 1.0, %v1379_v3 }
 0x641   :  { %1380 = vrcp.f32 %v450_v4 }
 0x64e   :  { %v1381_v8 = vpop.eup %1380 }
 0x64f   :  { %v454_v12 = vmul.f32 %v1381_v8, %v364_v42 }
 0x6af   :  { %v457_v10 = vpop.permute.xlu0 %456 }
 0x6b0   :  { %v459_v11 = vmul.f32 %v1381_v8, %v457_v10 }
 0x6b2   :  { %461 = vrot.lane.b32.xlu1 %v459_v11, %s1431_s1 }
 0x724   :  { %v462_v13 = vpop.permute.xlu1 %461 }
 0x725   :  { %v464_v14 = vadd.f32 %v462_v13, %v454_v12  ;;  %v164_v13 = vadd.f32 %v1517_v9, %v1583_v58 }
 0x727   :  { %1382 = vtanh.f32 %v464_v14 }
 0x734   :  { %v1383_v15 = vpop.eup %1382 }
 0x735   :  { %467 = vrot.lane.b32.xlu0 %v1383_v15, %s1430_s28 }
 0x7a7   :  { %v468_v16 = vpop.permute.xlu0 %467 }
 0x7a8   :  { %v470_v17 = vmul.f32 %v1381_v8, %v468_v16 }
 0x7aa   :  { %472 = vrot.lane.b32.xlu1 %v470_v17, %s1431_s1 }
 0x81c   :  { %v473_v18 = vpop.permute.xlu1 %472 }
 0x81d   :  { %1288 = vmatmul.mubr.msk.f32.vlgmr.msra.gmra.mxu1 %vm172_vm2, %v473_v18 }
 0x81e   :  { %1302 = vmatpush3.msra.mxu1 %v1459_v2  ;;  %1309 = vmatprep.mubr.msk.f32.mxu1 %vm1429_vm1, %v1428_v0 }
 0x81f   :  { %1303 = vmatprep.subr.mxu1 %v1428_v0 }
 0x820   :  { %1304 = vmatpush3.msra.mxu1 %v1473_v5 }
 0x821   :  { %1305 = vmatprep.subr.mxu1 %v1428_v0 }
 0x822   :  { %1306 = vmatpush3.msra.mxu1 %v1481_v6 }
 0x823   :  { %1307 = vmatprep.subr.mxu1 %v1428_v0 }
 0x824   :  { %1308 = vmatpush3.msra.mxu1 %v1489_v7 }
 0x825   :  { %1323 = vmatprep.subr.mxu1 %v1428_v0 }
 0x8dd   :  { %v542_v20 = vpop.f32.mrf.mxu1 }
 0x8de   :  { %v546_v21 = vadd.f32 %v542_v20, %v149_v19 }
 0x8df   :  { %v1289_v22 = vpop.f32.mrf.mxu1 }
 0x8e0   :  { %1384 = vtanh.f32 %v546_v21  ;;  %v1160_v24 = vmul.f32 -1.442695, %v546_v21 }
 0x8e2   :  { %1386 = vpow2.f32 %v1160_v24 }
 0x8ed   :  { %v1385_v23 = vpop.eup %1384 }
 0x8ee   :  { %556 = vrot.lane.b32.xlu0 %v1385_v23, %s1430_s28 }
 0x8ef   :  { %v1387_v25 = vpop.eup %1386 }
 0x8f0   :  { %v550_v26 = vadd.f32 1.0, %v1387_v25 }
 0x8f2   :  { %1388 = vrcp.f32 %v550_v26 }
 0x8ff   :  { %v1389_v27 = vpop.eup %1388 }
 0x900   :  { %v554_v30 = vmul.f32 %v1389_v27, %v464_v14 }
 0x960   :  { %v557_v28 = vpop.permute.xlu0 %556 }
 0x961   :  { %v559_v29 = vmul.f32 %v1389_v27, %v557_v28 }
 0x963   :  { %561 = vrot.lane.b32.xlu1 %v559_v29, %s1431_s1 }
 0x9d5   :  { %v562_v31 = vpop.permute.xlu1 %561 }
 0x9d6   :  { %v564_v32 = vadd.f32 %v562_v31, %v554_v30  ;;  %v169_v30 = vadd.f32 %v1581_v57, %v1517_v9  ;;  %v23_v57 = vld [vmem:[%s1704_s2 + $0x18] sm:$0xff] }
 0x9d8   :  { %1390 = vtanh.f32 %v564_v32 }
 0x9e5   :  { %v1391_v33 = vpop.eup %1390 }
 0x9e6   :  { %567 = vrot.lane.b32.xlu0 %v1391_v33, %s1430_s28 }
 0xa58   :  { %v568_v34 = vpop.permute.xlu0 %567 }
 0xa59   :  { %v570_v35 = vmul.f32 %v1389_v27, %v568_v34 }
 0xa5b   :  { %572 = vrot.lane.b32.xlu1 %v570_v35, %s1431_s1 }
 0xacd   :  { %v573_v36 = vpop.permute.xlu1 %572 }
 0xace   :  { %1299 = vmatmul.mubr.msk.f32.vlgmr.msra.gmra.mxu0 %vm172_vm2, %v573_v36 }
 0xacf   :  { %1313 = vmatpush3.msra.mxu0 %v1459_v2  ;;  %1320 = vmatprep.mubr.msk.f32.mxu0 %vm1429_vm1, %v1428_v0 }
 0xad0   :  { %1314 = vmatprep.subr.mxu0 %v1428_v0 }
 0xad1   :  { %1315 = vmatpush3.msra.mxu0 %v1473_v5 }
 0xad2   :  { %1316 = vmatprep.subr.mxu0 %v1428_v0 }
 0xad3   :  { %1317 = vmatpush3.msra.mxu0 %v1481_v6 }
 0xad4   :  { %1318 = vmatprep.subr.mxu0 %v1428_v0 }
 0xad5   :  { %1319 = vmatpush3.msra.mxu0 %v1489_v7 }
 0xad6   :  { %1334 = vmatprep.subr.mxu0 %v1428_v0 }
 0xb8e   :  { %v642_v38 = vpop.f32.mrf.mxu0 }
 0xb8f   :  { %v646_v39 = vadd.f32 %v642_v38, %v154_v37 }
 0xb90   :  { %v1300_v40 = vpop.f32.mrf.mxu0 }
 0xb91   :  { %1392 = vtanh.f32 %v646_v39  ;;  %v1162_v42 = vmul.f32 -1.442695, %v646_v39 }
 0xb93   :  { %1394 = vpow2.f32 %v1162_v42 }
 0xb9e   :  { %v1393_v41 = vpop.eup %1392 }
 0xb9f   :  { %656 = vrot.lane.b32.xlu0 %v1393_v41, %s1430_s28 }
 0xba0   :  { %v1395_v43 = vpop.eup %1394 }
 0xba1   :  { %v650_v44 = vadd.f32 1.0, %v1395_v43  ;;  %v22_v43 = vld [vmem:[%s1704_s2 + $0x10] sm:$0xff] }
 0xba3   :  { %1396 = vrcp.f32 %v650_v44  ;;  %v21_v44 = vld [vmem:[%s1704_s2 + $0x8] sm:$0xff] }
 0xbb0   :  { %v1397_v45 = vpop.eup %1396 }
 0xbb1   :  { %v654_v48 = vmul.f32 %v1397_v45, %v564_v32 }
 0xc11   :  { %v657_v46 = vpop.permute.xlu0 %656 }
 0xc12   :  { %v659_v47 = vmul.f32 %v1397_v45, %v657_v46 }
 0xc14   :  { %661 = vrot.lane.b32.xlu1 %v659_v47, %s1431_s1  ;;  %v28_v47 = vld [vmem:[%s1704_s2 + $0x40] sm:$0xff] }
 0xc86   :  { %v662_v49 = vpop.permute.xlu1 %661 }
 0xc87   :  { %v664_v50 = vadd.f32 %v662_v49, %v654_v48 }
 0xc89   :  { %1398 = vtanh.f32 %v664_v50 }
 0xc96   :  { %v1399_v51 = vpop.eup %1398 }
 0xc97   :  { %667 = vrot.lane.b32.xlu0 %v1399_v51, %s1430_s28  ;;  %v27_v51 = vld [vmem:[%s1704_s2 + $0x38] sm:$0xff] }
 0xd09   :  { %v668_v52 = vpop.permute.xlu0 %667 }
 0xd0a   :  { %v670_v53 = vmul.f32 %v1397_v45, %v668_v52  ;;  %v20_v45 = vld [vmem:[%s1704_s2] sm:$0xff]  ;;  %v26_v52 = vld [vmem:[%s1704_s2 + $0x30] sm:$0xff] }
 0xd0c   :  { %672 = vrot.lane.b32.xlu1 %v670_v53, %s1431_s1  ;;  %v25_v53 = vld [vmem:[%s1704_s2 + $0x28] sm:$0xff] }
 0xd7e   :  { %v673_v54 = vpop.permute.xlu1 %672 }
 0xd7f   :  { %1310 = vmatmul.mubr.msk.f32.vlgmr.msra.gmra.mxu1 %vm172_vm2, %v673_v54  ;;  %v1169_v54 = vld [vmem:[%s1704_s2 + $0x20] ss:$0 sm:$0xff] }
 0xd80   :  { %1324 = vmatpush3.msra.mxu1 %v1459_v2  ;;  %1331 = vmatprep.mubr.msk.f32.mxu1 %vm1429_vm1, %v1428_v0  ;;  %v159_v2 = vadd.f32 %v1577_v55, %v1517_v9 }
 0xd81   :  { %1325 = vmatprep.subr.mxu1 %v1428_v0 }
 0xd82   :  { %1326 = vmatpush3.msra.mxu1 %v1473_v5 }
 0xd83   :  { %1327 = vmatprep.subr.mxu1 %v1428_v0 }
 0xd84   :  { %1328 = vmatpush3.msra.mxu1 %v1481_v6 }
 0xd85   :  { %1329 = vmatprep.subr.mxu1 %v1428_v0 }
 0xd86   :  { %1330 = vmatpush3.msra.mxu1 %v1489_v7 }
 0xd87   :  { %1345 = vmatprep.subr.mxu1 %v1428_v0 }
 0xe3f   :  { %v742_v56 = vpop.f32.mrf.mxu1 }
 0xe40   :  { %v746_v59 = vadd.f32 %v742_v56, %v159_v2 }
 0xe41   :  { %v1311_v60 = vpop.f32.mrf.mxu1 }
 0xe42   :  { %1400 = vtanh.f32 %v746_v59  ;;  %v1164_v5 = vmul.f32 -1.442695, %v746_v59 }
 0xe44   :  { %1402 = vpow2.f32 %v1164_v5 }
 0xe4f   :  { %v1401_v61 = vpop.eup %1400 }
 0xe50   :  { %756 = vrot.lane.b32.xlu0 %v1401_v61, %s1430_s28  ;;  %v1171_v61 = vld [vmem:[%s1704_s2 + $0x48] ss:$0 sm:$0xff] }
 0xe51   :  { %v1403_v62 = vpop.eup %1402 }
 0xe52   :  { %v750_v6 = vadd.f32 1.0, %v1403_v62 }
 0xe54   :  { %1404 = vrcp.f32 %v750_v6 }
 0xe61   :  { %v1405_v63 = vpop.eup %1404 }
 0xe62   :  { %v754_v3 = vmul.f32 %v1405_v63, %v664_v50 }
 0xec2   :  { %v757_v1 = vpop.permute.xlu0 %756 }
 0xec3   :  { %v759_v7 = vmul.f32 %v1405_v63, %v757_v1 }
 0xec5   :  { %761 = vrot.lane.b32.xlu1 %v759_v7, %s1431_s1 }
 0xf37   :  { %v762_v4 = vpop.permute.xlu1 %761 }
 0xf38   :  { %v764_v55 = vadd.f32 %v762_v4, %v754_v3 }
 0xf3a   :  { %1406 = vtanh.f32 %v764_v55 }
 0xf47   :  { %v1407_v8 = vpop.eup %1406 }
 0xf48   :  { %767 = vrot.lane.b32.xlu0 %v1407_v8, %s1430_s28 }
 0xfba   :  { %v768_v10 = vpop.permute.xlu0 %767 }
 0xfbb   :  { %v770_v11 = vmul.f32 %v1405_v63, %v768_v10 }
 0xfbd   :  { %772 = vrot.lane.b32.xlu1 %v770_v11, %s1431_s1 }
0x102f   :  { %v773_v12 = vpop.permute.xlu1 %772 }
0x1030   :  { %1321 = vmatmul.mubr.msk.f32.vlgmr.msra.gmra.mxu0 %vm172_vm2, %v773_v12 }
0x1031   :  { %1342 = vmatprep.mubr.msk.f32.mxu0 %vm1429_vm1, %v1428_v0  ;;  %1335 = vmatpush3.msra.mxu0 %v23_v57 }
0x1032   :  { %1336 = vmatprep.subr.mxu0 %v1428_v0 }
0x1033   :  { %1337 = vmatpush3.msra.mxu0 %v22_v43 }
0x1034   :  { %1338 = vmatprep.subr.mxu0 %v1428_v0 }
0x1035   :  { %1339 = vmatpush3.msra.mxu0 %v21_v44 }
0x1036   :  { %1340 = vmatprep.subr.mxu0 %v1428_v0 }
0x1037   :  { %1341 = vmatpush3.msra.mxu0 %v20_v45 }
0x10f0   :  { %v842_v14 = vpop.f32.mrf.mxu0 }
0x10f1   :  { %v846_v15 = vadd.f32 %v842_v14, %v164_v13 }
0x10f2   :  { %v1322_v16 = vpop.f32.mrf.mxu0 }
0x10f3   :  { %1408 = vtanh.f32 %v846_v15  ;;  %v1166_v18 = vmul.f32 -1.442695, %v846_v15 }
0x10f5   :  { %1410 = vpow2.f32 %v1166_v18 }
0x1100   :  { %v1409_v17 = vpop.eup %1408 }
0x1101   :  { %856 = vrot.lane.b32.xlu0 %v1409_v17, %s1430_s28 }
0x1102   :  { %v1411_v19 = vpop.eup %1410 }
0x1103   :  { %v850_v20 = vadd.f32 1.0, %v1411_v19 }
0x1105   :  { %1412 = vrcp.f32 %v850_v20 }
0x1112   :  { %v1413_v21 = vpop.eup %1412 }
0x1113   :  { %v854_v24 = vmul.f32 %v1413_v21, %v764_v55 }
0x1173   :  { %v857_v22 = vpop.permute.xlu0 %856 }
0x1174   :  { %v859_v23 = vmul.f32 %v1413_v21, %v857_v22 }
0x1176   :  { %861 = vrot.lane.b32.xlu1 %v859_v23, %s1431_s1 }
0x11e8   :  { %v862_v25 = vpop.permute.xlu1 %861 }
0x11e9   :  { %v864_v58 = vadd.f32 %v862_v25, %v854_v24 }
0x11eb   :  { %1414 = vtanh.f32 %v864_v58 }
0x11f8   :  { %v1415_v26 = vpop.eup %1414 }
0x11f9   :  { %867 = vrot.lane.b32.xlu0 %v1415_v26, %s1430_s28 }
0x126b   :  { %v868_v27 = vpop.permute.xlu0 %867 }
0x126c   :  { %v870_v28 = vmul.f32 %v1413_v21, %v868_v27 }
0x126e   :  { %872 = vrot.lane.b32.xlu1 %v870_v28, %s1431_s1 }
0x12e0   :  { %v873_v29 = vpop.permute.xlu1 %872 }
0x12e1   :  { %1332 = vmatmul.mubr.msk.f32.vlgmr.msra.gmra.mxu1 %vm172_vm2, %v873_v29 }
0x12e2   :  { %1353 = vmatprep.mubr.msk.f32.mxu1 %vm1429_vm1, %v1428_v0  ;;  %1346 = vmatpush3.msra.mxu1 %v28_v47 }
0x12e3   :  { %1347 = vmatprep.subr.mxu1 %v1428_v0 }
0x12e4   :  { %1348 = vmatpush3.msra.mxu1 %v27_v51 }
0x12e5   :  { %1349 = vmatprep.subr.mxu1 %v1428_v0 }
0x12e6   :  { %1350 = vmatpush3.msra.mxu1 %v26_v52 }
0x12e7   :  { %1351 = vmatprep.subr.mxu1 %v1428_v0 }
0x12e8   :  { %1352 = vmatpush3.msra.mxu1 %v25_v53 }
0x13a1   :  { %v942_v31 = vpop.f32.mrf.mxu1 }
0x13a2   :  { %v946_v32 = vadd.f32 %v942_v31, %v169_v30 }
0x13a3   :  { %v1333_v33 = vpop.f32.mrf.mxu1 }
0x13a4   :  { %1416 = vtanh.f32 %v946_v32  ;;  %v1168_v35 = vmul.f32 -1.442695, %v946_v32 }
0x13a6   :  { %1418 = vpow2.f32 %v1168_v35 }
0x13b1   :  { %v1417_v34 = vpop.eup %1416 }
0x13b2   :  { %956 = vrot.lane.b32.xlu0 %v1417_v34, %s1430_s28 }
0x13b3   :  { %v1419_v36 = vpop.eup %1418 }
0x13b4   :  { %v950_v37 = vadd.f32 1.0, %v1419_v36 }
0x13b6   :  { %1420 = vrcp.f32 %v950_v37 }
0x13c3   :  { %v1421_v38 = vpop.eup %1420 }
0x13c4   :  { %v954_v41 = vmul.f32 %v1421_v38, %v864_v58 }
0x1424   :  { %v957_v39 = vpop.permute.xlu0 %956 }
0x1425   :  { %v959_v40 = vmul.f32 %v1421_v38, %v957_v39 }
0x1427   :  { %961 = vrot.lane.b32.xlu1 %v959_v40, %s1431_s1 }
0x1499   :  { %v962_v42 = vpop.permute.xlu1 %961 }
0x149a   :  { %v964_v9 = vadd.f32 %v962_v42, %v954_v41 }
0x149c   :  { %1422 = vtanh.f32 %v964_v9 }
0x14a9   :  { %v1423_v46 = vpop.eup %1422 }
0x14aa   :  { %967 = vrot.lane.b32.xlu0 %v1423_v46, %s1430_s28 }
0x151c   :  { %v968_v48 = vpop.permute.xlu0 %967 }
0x151d   :  { %v970_v49 = vmul.f32 %v1421_v38, %v968_v48 }
0x151f   :  { %976 = vrot.lane.b32.xlu1 %v970_v49, %s1431_s1 }
0x1591   :  { %v977_v50 = vpop.permute.xlu1 %976 }
0x1592   :  { %1343 = vmatmul.mubr.msk.f32.vlgmr.msra.gmra.mxu0 %vm172_vm2, %v977_v50 }
0x1652   :  { %v1046_v2 = vpop.f32.mrf.mxu0 }
0x1653   :  { %v1047_v56 = vadd.f32 %v1169_v54, %v1046_v2 }
0x1654   :  { %v1344_v59 = vpop.f32.mrf.mxu0 }
0x1655   :  { %v1050_v60 = vmax.f32 %v1047_v56, 0.0 }
0x1657   :  { %1354 = vmatmul.mubr.msk.f32.vlgmr.msra.gmra.mxu1 %vm172_vm2, %v1050_v60 }
0x1717   :  { %v1124_v0 = vpop.f32.mrf.mxu1 }
0x1718   :  { %v1125_v5 = vadd.f32 %v1171_v61, %v1124_v0 }
0x1719   :  { %v1355_v62 = vpop.f32.mrf.mxu1 }
0x171a   :  { %v1129_v6 = vsel %vm1128_vm3, %v1125_v5, -inf }
0x171b   :  { %1130 = vmax.xlane.f32.xlu0 %v1129_v6 }
0x17a4   :  { %v1131_v63 = vpop.xlane.xlu0 %1130 }
0x17a5   :  { %v1132_v1 = vsub.f32 %v1125_v5, %v1131_v63 }
0x17a7   :  { %v1133_v7 = vmul.f32 1.442695, %v1132_v1 }
0x17a9   :  { %1424 = vpow2.f32 %v1133_v7 }
0x17b6   :  { %v1425_v3 = vpop.eup %1424 }
0x17b7   :  { %v1135_v4 = vsel %vm1128_vm3, %v1425_v3, 0.0 }
0x17b8   :  { %1136 = vadd.xlane.f32.xlu1 %v1135_v4 }
0x1841   :  { %v1137_v55 = vpop.xlane.xlu1 %1136 }
0x1842   :  { %1426 = vrcp.f32 %v1137_v55 }
0x184f   :  { %v1427_v8 = vpop.eup %1426 }
0x1850   :  { %v1139_v10 = vmul.f32 %v1427_v8, %v1425_v3 }
0x1852   :  { %1140 = vst.msk [vmem:[%s1705_s3] sm:$0xff] %vm1128_vm3, %v1139_v10 }

</bundles_post_ra>
